<compile_context>
chip_gen: v7x
topology: tpu7x:2x2x1
jax: 0.10.0
libtpu: 0.0.40
codegen_flags: <defaults>
</compile_context>

<pallas_src>
import jax
import jax.numpy as jnp
from jax import lax
from jax.experimental import pallas as pl
from jax.experimental.pallas import tpu as pltpu


def _mlp_kernel(x_ref, w1t_ref, b1_ref, w2t_ref, b2_ref, o_ref):
    # x_ref  : (tb, I)  batch tile in its natural HBM layout (no wrapper copy)
    # w1t_ref: (H, I)   VMEM-resident across grid steps
    # b1_ref : (H, 1)   VMEM-resident
    # w2t_ref: (O, H)   VMEM-resident
    # b2_ref : (O, 1)   VMEM-resident
    # o_ref  : (O, tb)  batch on lanes -> lane-dense, unmasked stores
    x = x_ref[...]
    # h = W1 @ x^T : contract the feature dim of both operands -> (H, tb)
    h = lax.dot_general(w1t_ref[...], x, (((1,), (1,)), ((), ())),
                        preferred_element_type=jnp.float32)
    h = jnp.maximum(h + b1_ref[...], 0.0)                 # bias + ReLU on VPU
    # y = W2 @ h -> (O, tb)
    y = lax.dot_general(w2t_ref[...], h, (((1,), (0,)), ((), ())),
                        preferred_element_type=jnp.float32)
    o_ref[...] = (y + b2_ref[...]).astype(o_ref.dtype)


def net_forward(x, w1, b1, w2, b2, *, tile_b=1024):
    """relu(x @ w1 + b1) @ w2 + b2.   x: (B, I) -> (B, O)."""
    B, I = x.shape
    H = w1.shape[1]
    O = w2.shape[1]

    # Tiny parameter-only reshapes (4x32 / 32x2 / 32 / 2 elements).
    # x itself is passed straight through: no concatenate / pad / transpose.
    w1t = jnp.transpose(w1)          # (H, I)
    w2t = jnp.transpose(w2)          # (O, H)
    b1c = jnp.reshape(b1, (H, 1))
    b2c = jnp.reshape(b2, (O, 1))

    # Batch tiling.  Small batches: one full-extent block (always legal).
    # Large batches: lane-dense tiles (multiple of 128), capped so the grid
    # keeps >= 2 "parallel" steps for v7x's two TensorCores; the ragged last
    # block is masked by Pallas (rows are independent, so padded reads are
    # harmless and out-of-bounds columns are never written back).
    if B > 256:
        tb_cap = max(128, (tile_b // 128) * 128)
        tb_half = (((B + 1) // 2) + 127) // 128 * 128
        tb = min(tb_cap, tb_half)
    else:
        tb = B
    grid = (pl.cdiv(B, tb),)

    # Advisory cost estimate for XLA scheduling inside a larger DQN step.
    flops = 2 * B * (I * H + H * O)
    bytes_accessed = 4 * (B * I + I * H + H + H * O + O + O * B)

    out_t = pl.pallas_call(
        _mlp_kernel,
        out_shape=jax.ShapeDtypeStruct((O, B), jnp.float32),
        grid=grid,
        in_specs=[
            pl.BlockSpec((tb, I), lambda i: (i, 0)),   # x tile, walks the batch
            pl.BlockSpec((H, I), lambda i: (0, 0)),    # w1^T, VMEM-resident
            pl.BlockSpec((H, 1), lambda i: (0, 0)),    # b1,   VMEM-resident
            pl.BlockSpec((O, H), lambda i: (0, 0)),    # w2^T, VMEM-resident
            pl.BlockSpec((O, 1), lambda i: (0, 0)),    # b2,   VMEM-resident
        ],
        out_specs=pl.BlockSpec((O, tb), lambda i: (0, i)),
        compiler_params=pltpu.CompilerParams(
            dimension_semantics=("parallel",),
        ),
        cost_estimate=pl.CostEstimate(
            flops=flops, transcendentals=0, bytes_accessed=bytes_accessed),
    )(x, w1t, b1c, w2t, b2c)

    # Tiny (O, B) -> (B, O) transpose to match the nn.Module contract; cheap
    # compared to the lane-dense in-kernel stores it buys.  A downstream
    # argmax / Q(s,a) gather could consume the transposed layout directly.
    return jnp.transpose(out_t)


def init_params(key, input_size, hidden_size, output_size):
    # Deterministic init mimicking nn.Linear's uniform(-1/sqrt(fan_in), 1/sqrt(fan_in)).
    k1, k2, k3, k4 = jax.random.split(key, 4)
    lim1 = 1.0 / (input_size ** 0.5)
    lim2 = 1.0 / (hidden_size ** 0.5)
    w1 = jax.random.uniform(k1, (input_size, hidden_size), jnp.float32, -lim1, lim1)
    b1 = jax.random.uniform(k2, (1, hidden_size), jnp.float32, -lim1, lim1)
    w2 = jax.random.uniform(k3, (hidden_size, output_size), jnp.float32, -lim2, lim2)
    b2 = jax.random.uniform(k4, (1, output_size), jnp.float32, -lim2, lim2)
    return w1, b1, w2, b2


if __name__ == "__main__":
    # CartPole-style sizes: obs dim 4, hidden 32, 2 actions.
    input_size, hidden_size, output_size = 4, 32, 2

    key = jax.random.PRNGKey(0)
    kx1, kx2, kp = jax.random.split(key, 3)
    w1, b1, w2, b2 = init_params(kp, input_size, hidden_size, output_size)

    fwd = jax.jit(net_forward)

    ok = True
    # (a) small single-step batch (acting in the env): single full-extent block.
    x_small = jax.random.normal(kx1, (8, input_size), jnp.float32)
    out_small = jax.block_until_ready(fwd(x_small, w1, b1, w2, b2))
    ref_small = jnp.maximum(x_small @ w1 + b1, 0.0) @ w2 + b2
    ok &= out_small.shape == (8, output_size)
    ok &= bool(jnp.allclose(out_small, ref_small, atol=1e-5, rtol=1e-5))

    # (b) replay-minibatch batch: exercises the multi-step grid (2 tiles of 256)
    #     and the masked ragged tail.
    x_big = jax.random.normal(kx2, (300, input_size), jnp.float32)
    out_big = jax.block_until_ready(fwd(x_big, w1, b1, w2, b2))
    ref_big = jnp.maximum(x_big @ w1 + b1, 0.0) @ w2 + b2
    ok &= out_big.shape == (300, output_size)
    ok &= bool(jnp.allclose(out_big, ref_big, atol=1e-5, rtol=1e-5))

    if ok:
        print("KERNEL_OK")
</pallas_src>

<mosaic_0001>
module attributes {stable_mosaic.version = 11 : i64} {
  func.func @_mlp_kernel(%arg0: i32, %arg1: memref<8x4xf32, #tpu.memory_space<vmem>>, %arg2: memref<32x4xf32, #tpu.memory_space<vmem>>, %arg3: memref<32x1xf32, #tpu.memory_space<vmem>>, %arg4: memref<2x32xf32, #tpu.memory_space<vmem>>, %arg5: memref<2x1xf32, #tpu.memory_space<vmem>>, %arg6: memref<2x8xf32, #tpu.memory_space<vmem>>) attributes {dimension_semantics = [#tpu.dimension_semantics<parallel>], iteration_bounds = array<i64: 1>, scalar_prefetch = 0 : i64, scratch_operands = 0 : i64, tpu.core_type = #tpu.core_type<tc>, window_params = [{transform_indices = @transform_0, window_bounds = array<i64: 8, 4>}, {pipeline_mode = #tpu.pipeline_mode<synchronous>, transform_indices = @transform_1, window_bounds = array<i64: 32, 4>}, {pipeline_mode = #tpu.pipeline_mode<synchronous>, transform_indices = @transform_2, window_bounds = array<i64: 32, 1>}, {pipeline_mode = #tpu.pipeline_mode<synchronous>, transform_indices = @transform_3, window_bounds = array<i64: 2, 32>}, {pipeline_mode = #tpu.pipeline_mode<synchronous>, transform_indices = @transform_4, window_bounds = array<i64: 2, 1>}, {transform_indices = @transform_5, window_bounds = array<i64: 2, 8>}]} {
    %c0 = arith.constant 0 : index
    %c0_0 = arith.constant 0 : index
    %0 = vector.load %arg1[%c0, %c0_0] : memref<8x4xf32, #tpu.memory_space<vmem>>, vector<8x4xf32>
    %c0_1 = arith.constant 0 : index
    %c0_2 = arith.constant 0 : index
    %1 = vector.load %arg2[%c0_1, %c0_2] : memref<32x4xf32, #tpu.memory_space<vmem>>, vector<32x4xf32>
    %cst = arith.constant dense<0.000000e+00> : vector<32x8xf32>
    %2 = tpu.matmul %1, %0, %cst {dimension_numbers = #tpu.dot_dimension_numbers<[1], [1], [0], [0], [0, 0, 1, 0], [], []>} : vector<32x4xf32>, vector<8x4xf32>, vector<32x8xf32> -> vector<32x8xf32>
    %c0_3 = arith.constant 0 : index
    %c0_4 = arith.constant 0 : index
    %3 = vector.load %arg3[%c0_3, %c0_4] : memref<32x1xf32, #tpu.memory_space<vmem>>, vector<32x1xf32>
    %4 = vector.broadcast %3 : vector<32x1xf32> to vector<32x8xf32>
    %5 = arith.addf %2, %4 : vector<32x8xf32>
    %cst_5 = arith.constant 0.000000e+00 : f32
    %6 = vector.broadcast %cst_5 : f32 to vector<32x8xf32>
    %7 = arith.maximumf %5, %6 : vector<32x8xf32>
    %c0_6 = arith.constant 0 : index
    %c0_7 = arith.constant 0 : index
    %8 = vector.load %arg4[%c0_6, %c0_7] : memref<2x32xf32, #tpu.memory_space<vmem>>, vector<2x32xf32>
    %cst_8 = arith.constant dense<0.000000e+00> : vector<2x8xf32>
    %9 = tpu.matmul %8, %7, %cst_8 {dimension_numbers = #tpu.dot_dimension_numbers<[1], [0], [0], [1], [0, 0, 1, 1], [], []>} : vector<2x32xf32>, vector<32x8xf32>, vector<2x8xf32> -> vector<2x8xf32>
    %c0_9 = arith.constant 0 : index
    %c0_10 = arith.constant 0 : index
    %10 = vector.load %arg5[%c0_9, %c0_10] : memref<2x1xf32, #tpu.memory_space<vmem>>, vector<2x1xf32>
    %11 = vector.broadcast %10 : vector<2x1xf32> to vector<2x8xf32>
    %12 = arith.addf %9, %11 : vector<2x8xf32>
    %c0_11 = arith.constant 0 : index
    %c0_12 = arith.constant 0 : index
    %13 = vector.load %arg6[%c0_11, %c0_12] : memref<2x8xf32, #tpu.memory_space<vmem>>, vector<2x8xf32>
    tpu.vector_store %arg6[%c0_11, %c0_12], %12 {strides = array<i32>} : memref<2x8xf32, #tpu.memory_space<vmem>>, vector<2x8xf32>,
    return
  }
  func.func @transform_0(%arg0: i32) -> (i32, i32) {
    %c0_i32 = arith.constant 0 : i32
    %c0_i32_0 = arith.constant 0 : i32
    return %arg0, %c0_i32 : i32, i32
  }
  func.func @transform_1(%arg0: i32) -> (i32, i32) {
    %c0_i32 = arith.constant 0 : i32
    %c0_i32_0 = arith.constant 0 : i32
    %c0_i32_1 = arith.constant 0 : i32
    return %c0_i32, %c0_i32_0 : i32, i32
  }
  func.func @transform_2(%arg0: i32) -> (i32, i32) {
    %c0_i32 = arith.constant 0 : i32
    %c0_i32_0 = arith.constant 0 : i32
    %c0_i32_1 = arith.constant 0 : i32
    return %c0_i32, %c0_i32_0 : i32, i32
  }
  func.func @transform_3(%arg0: i32) -> (i32, i32) {
    %c0_i32 = arith.constant 0 : i32
    %c0_i32_0 = arith.constant 0 : i32
    %c0_i32_1 = arith.constant 0 : i32
    return %c0_i32, %c0_i32_0 : i32, i32
  }
  func.func @transform_4(%arg0: i32) -> (i32, i32) {
    %c0_i32 = arith.constant 0 : i32
    %c0_i32_0 = arith.constant 0 : i32
    %c0_i32_1 = arith.constant 0 : i32
    return %c0_i32, %c0_i32_0 : i32, i32
  }
  func.func @transform_5(%arg0: i32) -> (i32, i32) {
    %c0_i32 = arith.constant 0 : i32
    %c0_i32_0 = arith.constant 0 : i32
    return %c0_i32, %arg0 : i32, i32
  }
}

</mosaic_0001>

<bundles_post_ra>
// kernel: net_forward.1
= control target key start
LH: loop header
LB: loop body
LE: loop exit
PB: predicated region body
PF: predicated region fallthrough
CT: control target
= control target key end

     0   :  { %vm50_vm0 = vcmask 31744   ;;  %v324_v4 = vmov 0   ;;  %s410_s0 = inlined_call_operand.vmem [shape: f32[8,4], index: 0, kind: input, shape index: {}]   ;;  %s411_s1 = inlined_call_operand.vmem [shape: f32[32,4], index: 1, kind: input, shape index: {}]   ;;  %s412_s2 = inlined_call_operand.vmem [shape: f32[32,1], index: 2, kind: input, shape index: {}]   ;;  %s413_s3 = inlined_call_operand.vmem [shape: f32[2,32], index: 3, kind: input, shape index: {}]   ;;  %s414_s4 = inlined_call_operand.vmem [shape: f32[2,1], index: 4, kind: input, shape index: {}]   ;;  %s415_s5 = inlined_call_operand.hbm [shape: f32[2,8], index: 5, kind: output, shape index: {}]  }
   0x1   :  { %v21_v0 = vld [vmem:[%s410_s0] sm:$0xff]  ;;  %v23_v3 = vld [vmem:[%s411_s1 + $0x8] sm:$0xff]  ;;  %298 = vset.pattern.permute.xlu0 %v324_v4  ;;  %v28_v5 = vld [vmem:[%s412_s2 + $0x10] sm:$0xff]  ;;  %299 = vset.pattern.permute.xlu1 %v324_v4 }
   0x2   :  { %v22_v1 = vld [vmem:[%s411_s1] sm:$0xff]  ;;  %268 = vmatprep.subr.msk.mxu0 %vm50_vm0, %v21_v0  ;;  %v24_v6 = vld [vmem:[%s411_s1 + $0x10] sm:$0xff] }
   0x3   :  { %270 = vmatprep.mubr.msk.f32.mxu0 %vm50_vm0, %v22_v1  ;;  %v26_v2 = vld [vmem:[%s412_s2] sm:$0xff]  ;;  %269 = vmatpush3.xpose.msk.msra.mxu0 %vm50_vm0, %v21_v0 }
   0x4   :  { %32 = vperm.xlu0 %298, %v26_v2  }
   0x5   :  { %10 = vsyncpa [#allocation3], 0  ;;  %v27_v7 = vld [vmem:[%s412_s2 + $0x8] sm:$0xff]  ;;  %42 = vperm.xlu1 %299, %v28_v5   ;;  %v29_v8 = vld [vmem:[%s412_s2 + $0x18] sm:$0xff]  ;;  %v325_v11 = vmov 0.0|0.0   ;;  %vm326_vm1 = vmmov 0  }
   0x6   :  { %271 = vmatmul.mubr.msk.f32.vlgmr.msra.gmra.mrb[0].mxu0 %vm50_vm0, %v23_v3  ;;  %v25_v9 = vld [vmem:[%s411_s1 + $0x18] sm:$0xff]  ;;  %v156_v10 = vld [vmem:[%s414_s4] sm:$0x3]  ;;  %287 = vmatprep.subr.bf16.mxu1 %v325_v11  ;;  %v327_v12 = vmov 0.0   ;;  %vm162_vm2 = vcmask 261120   ;;  %s328_s4 = smov [#allocation2]  }
   0x7   :  { %273 = vmatprep.mubr.msk.f32.mxu0 %vm50_vm0, %v24_v6  ;;  %284 = vmatprep.mubr.msk.f32.mxu1 %vm326_vm1, %v327_v12  ;;  %v155_v31 = vld [vmem:[%s413_s3] sm:$0x3]  ;;  %s244_s12 = sshll.u32 %s328_s4, 4  ;;  %vm236_vm3 = vcmask 58368   ;;  %s245_s12 = int_to_ptr.vmem [resolvable:$true] %s244_s12 }
   0x8   :  { %37 = vperm.xlu0 %298, %v27_v7   ;;  %s300_s13 = scalar_lea.vmem %s245_s12, 32  ;;  %p305_p1 = scmp.lt.s32.totalorder %s245_s12, %s245_s12 }
   0x9   :  { %47 = vperm.xlu1 %299, %v29_v8   ;;  %p301_p0 = scmp.ne.s32.totalorder %s245_s12, %s300_s13  ;;  %p306_p2 = scmp.lt.s32.totalorder %s300_s13, %s300_s13 }
   0xa   :  { %274 = vmatmul.mubr.msk.f32.gmra.mrb[2].mxu0 %vm50_vm0, %v25_v9 }
   0xb   :  { %p307_p3 = por %p306_p2, %p305_p1 }
   0xc   :  { %159 = vperm.xlu0 %298, %v156_v10  }
   0xd   :  { %p308_p4 = pnand %p307_p3, %p301_p0 }
  0x83   :  { %v33_v13 = vpop.permute.xlu0 %32 }
  0x84   :  { %v43_v14 = vpop.permute.xlu1 %42 }
  0x87   :  { %v38_v15 = vpop.permute.xlu0 %37 }
  0x88   :  { %v48_v21 = vpop.permute.xlu1 %47 }
  0x8b   :  { %v160_v32 = vpop.permute.xlu0 %159 }
  0xd9   :  { %v272_v16 = vpop.f32.mrb[0].mxu0 }
  0xda   :  { %v138_v17 = vadd.f32 %v272_v16, %v38_v15  ;;  %v132_v18 = vpop.f32.mrb[1].mxu0 }
  0xdb   :  { %v133_v19 = vadd.f32 %v132_v18, %v33_v13 }
  0xdc   :  { %v152_v20 = vmax.f32 %v138_v17, 0.0 }
  0xdd   :  { %v151_v22 = vmax.f32 %v133_v19, 0.0  ;;  %v275_v23 = vpop.f32.mrb[2].mxu0 }
  0xde   :  { %v148_v24 = vadd.f32 %v275_v23, %v48_v21  ;;  %v142_v25 = vpop.f32.mrb[3].mxu0 }
  0xdf   :  { %v143_v26 = vadd.f32 %v142_v25, %v43_v14  ;;  %v288_v27 = vpack.c.bf16 %v152_v20, %v151_v22 }
  0xe0   :  { %v154_v28 = vmax.f32 %v148_v24, 0.0 }
  0xe1   :  { %v153_v29 = vmax.f32 %v143_v26, 0.0  ;;  %289 = vmatpush3.bf16.msra.mxu1 %v288_v27 }
  0xe2   :  { %290 = vmatprep.subr.bf16.mxu1 %v325_v11 }
  0xe3   :  { %v291_v30 = vpack.c.bf16 %v154_v28, %v153_v29 }
  0xe5   :  { %292 = vmatpush3.bf16.msra.mxu1 %v291_v30 }
  0xe8   :  { %285 = vmatmul.mubr.msk.f32.vlgmr.msra.gmra.mrb[0].mxu1 %vm162_vm2, %v155_v31 }
 0x1bb   :  { %v232_v33 = vpop.f32.mrb[0].mxu1 }
 0x1bc   :  { %v233_v34 = vadd.f32 %v232_v33, %v160_v32  ;;  %v286_v35 = vpop.f32.mrb[1].mxu1 }
 0x1be   :  { %237 = vst.msk [vmem:[#allocation2] sm:$0x3] %vm236_vm3, %v233_v34 }
 0x1bf   :  { %311 = shalt.err (!%p308_p4)
}
 0x1c0   :  { %s312_s15 = scalar_lea.hbm %s415_s5, 32 }
 0x1c1   :  { %p313_p5 = scmp.ne.s32.totalorder %s415_s5, %s312_s15  ;;  %p316_p6 = scmp.lt.u32.totalorder %s312_s15, %s415_s5 }
 0x1c3   :  { %p318_p7 = pnand %p316_p6, %p313_p5 }
 0x1c5   :  { %321 = shalt.err (!%p318_p7)
}
 0x1c6   :  { %247 = dma.vmem_to_hbm [thread:$0]  %s245_s12, 32, %s415_s5, [#allocation3]  }
 0x1c7   :  { %322 = dma.done.wait [#allocation3], 32  }
 0x1c8   :  { %323 = vsyncadd [#allocation3], 4294967264 }
 0x1c9   :  { %251 = vsyncpa [#allocation3], 1 }

</bundles_post_ra>
